<compile_context>
chip_gen: v5e
topology: v5e:2x2
jax: 0.10.0
libtpu: 0.0.40
codegen_flags: <defaults>
</compile_context>

<pallas_src>
import jax
import jax.numpy as jnp
from jax.experimental import pallas as pl
from jax.experimental.pallas import tpu as pltpu

LANE = 128      # vreg lane width  -> feature dims padded to this
SUBLANE = 8     # vreg sublane width -> batch tiles are multiples of this


def _round_up(n, m):
    return ((n + m - 1) // m) * m


def _sigmoid(z):
    # Single EUP tanh instead of exp + divide (only one EUP slot per bundle).
    return 0.5 * jnp.tanh(0.5 * z) + 0.5


# ---------------------------------------------------------------------------
# Kernels
# ---------------------------------------------------------------------------
def _mlp_kernel(x_ref, w1_ref, b1_ref, w2_ref, b2_ref, w3_ref, b3_ref, out_ref):
    """sigmoid(fc1) -> sigmoid(fc2) -> fc3 on one batch tile (no hidden out)."""
    x = x_ref[...]
    h1 = _sigmoid(jnp.dot(x, w1_ref[...], preferred_element_type=jnp.float32)
                  + b1_ref[...])
    h2 = _sigmoid(jnp.dot(h1, w2_ref[...], preferred_element_type=jnp.float32)
                  + b2_ref[...])
    out = jnp.dot(h2, w3_ref[...], preferred_element_type=jnp.float32) + b3_ref[...]
    out_ref[...] = out.astype(out_ref.dtype)


def _mlp_kernel_hid(x_ref, w1_ref, b1_ref, w2_ref, b2_ref, w3_ref, b3_ref,
                    out_ref, hid_ref):
    """Same as _mlp_kernel but also writes the second hidden activation."""
    x = x_ref[...]
    h1 = _sigmoid(jnp.dot(x, w1_ref[...], preferred_element_type=jnp.float32)
                  + b1_ref[...])
    h2 = _sigmoid(jnp.dot(h1, w2_ref[...], preferred_element_type=jnp.float32)
                  + b2_ref[...])
    out = jnp.dot(h2, w3_ref[...], preferred_element_type=jnp.float32) + b3_ref[...]
    out_ref[...] = out.astype(out_ref.dtype)
    hid_ref[...] = h2.astype(hid_ref.dtype)


# ---------------------------------------------------------------------------
# Parameter prep (one-time): transpose to (in, out) and zero-pad to 128 lanes.
# ---------------------------------------------------------------------------
def prepare_params(params):
    w1, b1, w2, b2, w3, b3 = params
    Ni, Nh1, Nh2, No = w1.shape[1], w1.shape[0], w2.shape[0], w3.shape[0]
    Ni_p, Nh1_p, Nh2_p, No_p = (_round_up(d, LANE) for d in (Ni, Nh1, Nh2, No))

    def pad_wt(w, rows_p, cols_p):
        wt = w.T.astype(jnp.float32)                       # (in, out)
        buf = jnp.zeros((rows_p, cols_p), jnp.float32)
        return buf.at[: wt.shape[0], : wt.shape[1]].set(wt)

    def pad_b(b, cols_p):
        buf = jnp.zeros((1, cols_p), jnp.float32)
        return buf.at[0, : b.shape[0]].set(b.astype(jnp.float32))

    padded = (pad_wt(w1, Ni_p, Nh1_p), pad_b(b1, Nh1_p),
              pad_wt(w2, Nh1_p, Nh2_p), pad_b(b2, Nh2_p),
              pad_wt(w3, Nh2_p, No_p), pad_b(b3, No_p))
    dims = (Ni, Nh1, Nh2, No)
    return padded, dims


# ---------------------------------------------------------------------------
# Forward wrapper (mirrors NetSlow.forward(x, additional_out))
# ---------------------------------------------------------------------------
def net_slow_forward(x, prepared, additional_out=False, batch_tile=128):
    padded, (Ni, Nh1, Nh2, No) = prepared
    w1t, b1r, w2t, b2r, w3t, b3r = padded
    B = x.shape[0]
    Ni_p, Nh1_p = w1t.shape
    Nh2_p = w2t.shape[1]
    No_p = w3t.shape[1]

    # Batch tile: multiple of the sublane width; pad batch to a tile multiple.
    bt = _round_up(min(batch_tile, _round_up(B, SUBLANE)), SUBLANE)
    B_p = _round_up(B, bt)

    x_p = jnp.zeros((B_p, Ni_p), jnp.float32).at[:B, :Ni].set(
        x.astype(jnp.float32))

    grid = (B_p // bt,)
    batch_spec = lambda cols: pl.BlockSpec((bt, cols), lambda i: (i, 0))
    resident = lambda shape: pl.BlockSpec(shape, lambda i: (0, 0))

    in_specs = [
        batch_spec(Ni_p),                                    # x (tiled over batch)
        resident((Ni_p, Nh1_p)), resident((1, Nh1_p)),       # fc1
        resident((Nh1_p, Nh2_p)), resident((1, Nh2_p)),      # fc2
        resident((Nh2_p, No_p)), resident((1, No_p)),        # fc3
    ]
    cparams = pltpu.CompilerParams(dimension_semantics=("parallel",))

    if additional_out:
        out_p, hid_p = pl.pallas_call(
            _mlp_kernel_hid,
            out_shape=(jax.ShapeDtypeStruct((B_p, No_p), jnp.float32),
                       jax.ShapeDtypeStruct((B_p, Nh2_p), jnp.float32)),
            grid=grid,
            in_specs=in_specs,
            out_specs=(batch_spec(No_p), batch_spec(Nh2_p)),
            compiler_params=cparams,
        )(x_p, w1t, b1r, w2t, b2r, w3t, b3r)
        return out_p[:B, :No], hid_p[:B, :Nh2]

    out_p = pl.pallas_call(
        _mlp_kernel,
        out_shape=jax.ShapeDtypeStruct((B_p, No_p), jnp.float32),
        grid=grid,
        in_specs=in_specs,
        out_specs=batch_spec(No_p),
        compiler_params=cparams,
    )(x_p, w1t, b1r, w2t, b2r, w3t, b3r)
    return out_p[:B, :No]


# ---------------------------------------------------------------------------
# Init + reference
# ---------------------------------------------------------------------------
def init_params(key, Ni, Nh1, Nh2, No):
    """PyTorch-style uniform(+/- 1/sqrt(fan_in)) init, PyTorch (out, in) layout."""
    ks = jax.random.split(key, 6)

    def lin(kw, kb, fan_in, fan_out):
        bound = 1.0 / jnp.sqrt(fan_in)
        w = jax.random.uniform(kw, (fan_out, fan_in), jnp.float32, -bound, bound)
        b = jax.random.uniform(kb, (fan_out,), jnp.float32, -bound, bound)
        return w, b

    w1, b1 = lin(ks[0], ks[1], Ni, Nh1)
    w2, b2 = lin(ks[2], ks[3], Nh1, Nh2)
    w3, b3 = lin(ks[4], ks[5], Nh2, No)
    return (w1, b1, w2, b2, w3, b3)


def _reference_forward(x, params):
    w1, b1, w2, b2, w3, b3 = params
    h1 = jax.nn.sigmoid(x @ w1.T + b1)
    h2 = jax.nn.sigmoid(h1 @ w2.T + b2)
    return h2 @ w3.T + b3, h2


if __name__ == "__main__":
    # Small shapes consistent with the module's MLP structure.
    B, Ni, Nh1, Nh2, No = 8, 32, 64, 32, 8

    key = jax.random.PRNGKey(0)
    kx, kp = jax.random.split(key)
    x = jax.random.normal(kx, (B, Ni), dtype=jnp.float32)
    params = init_params(kp, Ni, Nh1, Nh2, No)

    prepared = prepare_params(params)   # one-time transpose + lane padding

    # additional_out=True path (covers both outputs).
    out, hid = net_slow_forward(x, prepared, additional_out=True)
    out = jax.block_until_ready(out)
    hid = jax.block_until_ready(hid)

    # Common path (no hidden writeback).
    out2 = jax.block_until_ready(net_slow_forward(x, prepared, additional_out=False))

    ref_out, ref_hid = _reference_forward(x, params)
    assert out.shape == (B, No)
    assert hid.shape == (B, Nh2)
    assert jnp.allclose(out, ref_out, atol=1e-5, rtol=1e-5)
    assert jnp.allclose(hid, ref_hid, atol=1e-5, rtol=1e-5)
    assert jnp.allclose(out2, ref_out, atol=1e-5, rtol=1e-5)

    print("KERNEL_OK")
</pallas_src>

<mosaic_0001>
module attributes {stable_mosaic.version = 11 : i64} {
  func.func @_mlp_kernel_hid(%arg0: i32, %arg1: memref<8x128xf32, #tpu.memory_space<vmem>>, %arg2: memref<128x128xf32, #tpu.memory_space<vmem>>, %arg3: memref<1x128xf32, #tpu.memory_space<vmem>>, %arg4: memref<128x128xf32, #tpu.memory_space<vmem>>, %arg5: memref<1x128xf32, #tpu.memory_space<vmem>>, %arg6: memref<128x128xf32, #tpu.memory_space<vmem>>, %arg7: memref<1x128xf32, #tpu.memory_space<vmem>>, %arg8: memref<8x128xf32, #tpu.memory_space<vmem>>, %arg9: memref<8x128xf32, #tpu.memory_space<vmem>>) attributes {dimension_semantics = [#tpu.dimension_semantics<parallel>], iteration_bounds = array<i64: 1>, scalar_prefetch = 0 : i64, scratch_operands = 0 : i64, tpu.core_type = #tpu.core_type<tc>, window_params = [{transform_indices = @transform_0, window_bounds = array<i64: 8, 128>}, {pipeline_mode = #tpu.pipeline_mode<synchronous>, transform_indices = @transform_1, window_bounds = array<i64: 128, 128>}, {pipeline_mode = #tpu.pipeline_mode<synchronous>, transform_indices = @transform_2, window_bounds = array<i64: 1, 128>}, {pipeline_mode = #tpu.pipeline_mode<synchronous>, transform_indices = @transform_3, window_bounds = array<i64: 128, 128>}, {pipeline_mode = #tpu.pipeline_mode<synchronous>, transform_indices = @transform_4, window_bounds = array<i64: 1, 128>}, {pipeline_mode = #tpu.pipeline_mode<synchronous>, transform_indices = @transform_5, window_bounds = array<i64: 128, 128>}, {pipeline_mode = #tpu.pipeline_mode<synchronous>, transform_indices = @transform_6, window_bounds = array<i64: 1, 128>}, {transform_indices = @transform_7, window_bounds = array<i64: 8, 128>}, {transform_indices = @transform_8, window_bounds = array<i64: 8, 128>}]} {
    %c0 = arith.constant 0 : index
    %c0_0 = arith.constant 0 : index
    %0 = vector.load %arg1[%c0, %c0_0] : memref<8x128xf32, #tpu.memory_space<vmem>>, vector<8x128xf32>
    %c0_1 = arith.constant 0 : index
    %c0_2 = arith.constant 0 : index
    %1 = vector.load %arg2[%c0_1, %c0_2] : memref<128x128xf32, #tpu.memory_space<vmem>>, vector<128x128xf32>
    %cst = arith.constant dense<0.000000e+00> : vector<8x128xf32>
    %2 = tpu.matmul %0, %1, %cst {dimension_numbers = #tpu.dot_dimension_numbers<[1], [0], [0], [1], [0, 0, 1, 1], [], []>} : vector<8x128xf32>, vector<128x128xf32>, vector<8x128xf32> -> vector<8x128xf32>
    %c0_3 = arith.constant 0 : index
    %c0_4 = arith.constant 0 : index
    %3 = vector.load %arg3[%c0_3, %c0_4] : memref<1x128xf32, #tpu.memory_space<vmem>>, vector<1x128xf32>
    %4 = vector.broadcast %3 : vector<1x128xf32> to vector<8x128xf32>
    %5 = arith.addf %2, %4 : vector<8x128xf32>
    %cst_5 = arith.constant 5.000000e-01 : f32
    %6 = vector.broadcast %cst_5 : f32 to vector<8x128xf32>
    %7 = arith.mulf %6, %5 : vector<8x128xf32>
    %8 = math.tanh %7 : vector<8x128xf32>
    %cst_6 = arith.constant 5.000000e-01 : f32
    %9 = vector.broadcast %cst_6 : f32 to vector<8x128xf32>
    %10 = arith.mulf %9, %8 : vector<8x128xf32>
    %cst_7 = arith.constant 5.000000e-01 : f32
    %11 = vector.broadcast %cst_7 : f32 to vector<8x128xf32>
    %12 = arith.addf %10, %11 : vector<8x128xf32>
    %c0_8 = arith.constant 0 : index
    %c0_9 = arith.constant 0 : index
    %13 = vector.load %arg4[%c0_8, %c0_9] : memref<128x128xf32, #tpu.memory_space<vmem>>, vector<128x128xf32>
    %cst_10 = arith.constant dense<0.000000e+00> : vector<8x128xf32>
    %14 = tpu.matmul %12, %13, %cst_10 {dimension_numbers = #tpu.dot_dimension_numbers<[1], [0], [0], [1], [0, 0, 1, 1], [], []>} : vector<8x128xf32>, vector<128x128xf32>, vector<8x128xf32> -> vector<8x128xf32>
    %c0_11 = arith.constant 0 : index
    %c0_12 = arith.constant 0 : index
    %15 = vector.load %arg5[%c0_11, %c0_12] : memref<1x128xf32, #tpu.memory_space<vmem>>, vector<1x128xf32>
    %16 = vector.broadcast %15 : vector<1x128xf32> to vector<8x128xf32>
    %17 = arith.addf %14, %16 : vector<8x128xf32>
    %cst_13 = arith.constant 5.000000e-01 : f32
    %18 = vector.broadcast %cst_13 : f32 to vector<8x128xf32>
    %19 = arith.mulf %18, %17 : vector<8x128xf32>
    %20 = math.tanh %19 : vector<8x128xf32>
    %cst_14 = arith.constant 5.000000e-01 : f32
    %21 = vector.broadcast %cst_14 : f32 to vector<8x128xf32>
    %22 = arith.mulf %21, %20 : vector<8x128xf32>
    %cst_15 = arith.constant 5.000000e-01 : f32
    %23 = vector.broadcast %cst_15 : f32 to vector<8x128xf32>
    %24 = arith.addf %22, %23 : vector<8x128xf32>
    %c0_16 = arith.constant 0 : index
    %c0_17 = arith.constant 0 : index
    %25 = vector.load %arg6[%c0_16, %c0_17] : memref<128x128xf32, #tpu.memory_space<vmem>>, vector<128x128xf32>
    %cst_18 = arith.constant dense<0.000000e+00> : vector<8x128xf32>
    %26 = tpu.matmul %24, %25, %cst_18 {dimension_numbers = #tpu.dot_dimension_numbers<[1], [0], [0], [1], [0, 0, 1, 1], [], []>} : vector<8x128xf32>, vector<128x128xf32>, vector<8x128xf32> -> vector<8x128xf32>
    %c0_19 = arith.constant 0 : index
    %c0_20 = arith.constant 0 : index
    %27 = vector.load %arg7[%c0_19, %c0_20] : memref<1x128xf32, #tpu.memory_space<vmem>>, vector<1x128xf32>
    %28 = vector.broadcast %27 : vector<1x128xf32> to vector<8x128xf32>
    %29 = arith.addf %26, %28 : vector<8x128xf32>
    %c0_21 = arith.constant 0 : index
    %c0_22 = arith.constant 0 : index
    %30 = vector.load %arg8[%c0_21, %c0_22] : memref<8x128xf32, #tpu.memory_space<vmem>>, vector<8x128xf32>
    tpu.vector_store %arg8[%c0_21, %c0_22], %29 {strides = array<i32>} : memref<8x128xf32, #tpu.memory_space<vmem>>, vector<8x128xf32>,
    %c0_23 = arith.constant 0 : index
    %c0_24 = arith.constant 0 : index
    %31 = vector.load %arg9[%c0_23, %c0_24] : memref<8x128xf32, #tpu.memory_space<vmem>>, vector<8x128xf32>
    tpu.vector_store %arg9[%c0_23, %c0_24], %24 {strides = array<i32>} : memref<8x128xf32, #tpu.memory_space<vmem>>, vector<8x128xf32>,
    return
  }
  func.func @transform_0(%arg0: i32) -> (i32, i32) {
    %c0_i32 = arith.constant 0 : i32
    %c0_i32_0 = arith.constant 0 : i32
    return %arg0, %c0_i32 : i32, i32
  }
  func.func @transform_1(%arg0: i32) -> (i32, i32) {
    %c0_i32 = arith.constant 0 : i32
    %c0_i32_0 = arith.constant 0 : i32
    %c0_i32_1 = arith.constant 0 : i32
    return %c0_i32, %c0_i32_0 : i32, i32
  }
  func.func @transform_2(%arg0: i32) -> (i32, i32) {
    %c0_i32 = arith.constant 0 : i32
    %c0_i32_0 = arith.constant 0 : i32
    %c0_i32_1 = arith.constant 0 : i32
    return %c0_i32, %c0_i32_0 : i32, i32
  }
  func.func @transform_3(%arg0: i32) -> (i32, i32) {
    %c0_i32 = arith.constant 0 : i32
    %c0_i32_0 = arith.constant 0 : i32
    %c0_i32_1 = arith.constant 0 : i32
    return %c0_i32, %c0_i32_0 : i32, i32
  }
  func.func @transform_4(%arg0: i32) -> (i32, i32) {
    %c0_i32 = arith.constant 0 : i32
    %c0_i32_0 = arith.constant 0 : i32
    %c0_i32_1 = arith.constant 0 : i32
    return %c0_i32, %c0_i32_0 : i32, i32
  }
  func.func @transform_5(%arg0: i32) -> (i32, i32) {
    %c0_i32 = arith.constant 0 : i32
    %c0_i32_0 = arith.constant 0 : i32
    %c0_i32_1 = arith.constant 0 : i32
    return %c0_i32, %c0_i32_0 : i32, i32
  }
  func.func @transform_6(%arg0: i32) -> (i32, i32) {
    %c0_i32 = arith.constant 0 : i32
    %c0_i32_0 = arith.constant 0 : i32
    %c0_i32_1 = arith.constant 0 : i32
    return %c0_i32, %c0_i32_0 : i32, i32
  }
  func.func @transform_7(%arg0: i32) -> (i32, i32) {
    %c0_i32 = arith.constant 0 : i32
    %c0_i32_0 = arith.constant 0 : i32
    return %arg0, %c0_i32 : i32, i32
  }
  func.func @transform_8(%arg0: i32) -> (i32, i32) {
    %c0_i32 = arith.constant 0 : i32
    %c0_i32_0 = arith.constant 0 : i32
    return %arg0, %c0_i32 : i32, i32
  }
}

</mosaic_0001>

<bundles_post_ra>
// kernel: tpu_custom_call.1
= control target key start
LH: loop header
LB: loop body
LE: loop exit
PB: predicated region body
PF: predicated region fallthrough
CT: control target
= control target key end

     0   :  { %14 = vsyncpa [#allocation3], 0  ;;  %s506_s0 = inlined_call_operand.hbm [shape: f32[8,128], index: 0, kind: input, shape index: {}]   ;;  %s507_s1 = inlined_call_operand.hbm [shape: f32[128,128], index: 1, kind: input, shape index: {}]   ;;  %s508_s2 = inlined_call_operand.vmem [shape: f32[1,128], index: 2, kind: input, shape index: {}]   ;;  %s509_s3 = inlined_call_operand.hbm [shape: f32[128,128], index: 3, kind: input, shape index: {}]   ;;  %s510_s4 = inlined_call_operand.vmem [shape: f32[1,128], index: 4, kind: input, shape index: {}]   ;;  %s511_s5 = inlined_call_operand.hbm [shape: f32[128,128], index: 5, kind: input, shape index: {}]   ;;  %s512_s6 = inlined_call_operand.vmem [shape: f32[1,128], index: 6, kind: input, shape index: {}]   ;;  %s513_s7 = inlined_call_operand.hbm [shape: f32[8,128], index: 7, kind: output, shape index: {0}]   ;;  %s514_s8 = inlined_call_operand.hbm [shape: f32[8,128], index: 8, kind: output, shape index: {1}]  }
   0x1   :  { %15 = vsyncpa [#allocation6], 0 }
   0x2   :  { %16 = vsyncpa [#allocation9], 0 }
   0x3   :  { %17 = vsyncpa [#allocation4], 0  ;;  %s34_s29 = sshll.u32 %s507_s1, 4  ;;  %s35_s29 = int_to_ptr.hbm [resolvable:$true] %s34_s29 }
   0x4   :  { %18 = vsyncpa [#allocation12], 0  ;;  %s426_s30 = smov [#allocation5]   ;;  %s24_s12 = sshll.u32 %s506_s0, 4  ;;  %s25_s12 = int_to_ptr.hbm [resolvable:$true] %s24_s12 }
   0x5   :  { %s36_s9 = sshll.u32 %s426_s30, 4  ;;  %s427_s13 = smov 128   ;;  %s37_s9 = int_to_ptr.vmem [resolvable:$true] %s36_s9 }
   0x6   :  { %s428_s14 = smov 8   ;;  %s429_s15 = smov [#allocation2]  }
   0x7   :  { %42 = dma.hbm_to_vmem [thread:$0]  %s35_s29, 2048, %s37_s9, [#allocation6], %s427_s13, %s427_s13, %s428_s14  }
   0x8   :  { %s26_s16 = sshll.u32 %s429_s15, 4  ;;  %s49_s19 = sshll.u32 %s509_s3, 4  ;;  %s27_s16 = int_to_ptr.vmem [resolvable:$true] %s26_s16  ;;  %s50_s19 = int_to_ptr.hbm [resolvable:$true] %s49_s19 }
   0x9   :  { %29 = dma.hbm_to_vmem [thread:$0]  %s25_s12, 128, %s27_s16, [#allocation3]  }
   0xa   :  { %s64_s21 = sshll.u32 %s511_s5, 4  ;;  %s430_s22 = smov [#allocation7]   ;;  %s65_s21 = int_to_ptr.hbm [resolvable:$true] %s64_s21 }
   0xb   :  { %s51_s23 = sshll.u32 %s430_s22, 4  ;;  %s431_s0 = smov [#allocation8]   ;;  %s52_s23 = int_to_ptr.vmem [resolvable:$true] %s51_s23 }
   0xc   :  { %57 = dma.hbm_to_vmem [thread:$0]  %s50_s19, 2048, %s52_s23, [#allocation6], %s427_s13, %s427_s13, %s428_s14  }
   0xd   :  { %s66_s24 = sshll.u32 %s431_s0, 4  ;;  %s67_s24 = int_to_ptr.vmem [resolvable:$true] %s66_s24 }
   0xe   :  { %72 = dma.hbm_to_vmem [thread:$0]  %s65_s21, 2048, %s67_s24, [#allocation9], %s427_s13, %s427_s13, %s428_s14  }
   0xf   :  { %416 = dma.done.wait [#allocation3], 128  }
  0x10   :  { %417 = vsyncadd [#allocation3], 4294967168 }
  0x11   :  { %418 = dma.done.wait [#allocation6], 4096  }
  0x12   :  { %419 = vsyncadd [#allocation6], 4294963200 }
  0x13   :  { %420 = dma.done.wait [#allocation9], 2048  }
  0x14   :  { %421 = vsyncadd [#allocation9], 4294965248  ;;  %v107_v0 = vld [vmem:[#allocation5 + $0x78] sm:$0xff]  ;;  %v106_v1 = vld [vmem:[#allocation5 + $0x70] sm:$0xff]  ;;  %s432_s26 = smov [#allocation11]   ;;  %s240_s30 = sshll.u32 %s514_s8, 4  ;;  %s241_s30 = int_to_ptr.hbm [resolvable:$true] %s240_s30 }
  0x15   :  { %112 = vmatpush.msra.mxu0 %v107_v0  ;;  %v105_v2 = vld [vmem:[#allocation5 + $0x68] sm:$0xff]  ;;  %v104_v3 = vld [vmem:[#allocation5 + $0x60] sm:$0xff]  ;;  %v151_v4 = vld [vmem:[#allocation7 + $0x78] sm:$0xff]  ;;  %s238_s27 = sshll.u32 %s432_s26, 4  ;;  %s433_s10 = smov [#allocation10]   ;;  %s239_s27 = int_to_ptr.vmem [resolvable:$true] %s238_s27 }
  0x16   :  { %v103_v5 = vld [vmem:[#allocation5 + $0x58] sm:$0xff]  ;;  %156 = vmatpush.msra.mxu1 %v151_v4  ;;  %v150_v6 = vld [vmem:[#allocation7 + $0x70] sm:$0xff]  ;;  %v149_v7 = vld [vmem:[#allocation7 + $0x68] sm:$0xff]  ;;  %s227_s11 = sshll.u32 %s433_s10, 4  ;;  %s229_s14 = sshll.u32 %s513_s7, 4  ;;  %s228_s11 = int_to_ptr.vmem [resolvable:$true] %s227_s11  ;;  %s230_s14 = int_to_ptr.hbm [resolvable:$true] %s229_s14 }
  0x17   :  { %113 = vmatpush.msra.mxu0 %v106_v1  ;;  %v102_v8 = vld [vmem:[#allocation5 + $0x50] sm:$0xff]  ;;  %v148_v9 = vld [vmem:[#allocation7 + $0x60] sm:$0xff]  ;;  %v101_v10 = vld [vmem:[#allocation5 + $0x48] sm:$0xff] }
  0x18   :  { %157 = vmatpush.msra.mxu1 %v150_v6  ;;  %v147_v11 = vld [vmem:[#allocation7 + $0x58] sm:$0xff]  ;;  %v100_v12 = vld [vmem:[#allocation5 + $0x40] sm:$0xff]  ;;  %v146_v13 = vld [vmem:[#allocation7 + $0x50] sm:$0xff] }
  0x19   :  { %114 = vmatpush.msra.mxu0 %v105_v2  ;;  %v99_v14 = vld [vmem:[#allocation5 + $0x38] sm:$0xff]  ;;  %v145_v15 = vld [vmem:[#allocation7 + $0x48] sm:$0xff]  ;;  %v98_v16 = vld [vmem:[#allocation5 + $0x30] sm:$0xff] }
  0x1a   :  { %158 = vmatpush.msra.mxu1 %v149_v7  ;;  %v144_v17 = vld [vmem:[#allocation7 + $0x40] sm:$0xff]  ;;  %v97_v18 = vld [vmem:[#allocation5 + $0x28] sm:$0xff]  ;;  %v95_v20 = vld [vmem:[#allocation5 + $0x18] sm:$0xff] }
  0x1b   :  { %115 = vmatpush.msra.mxu0 %v104_v3  ;;  %v96_v19 = vld [vmem:[#allocation5 + $0x20] sm:$0xff]  ;;  %v94_v21 = vld [vmem:[#allocation5 + $0x10] sm:$0xff]  ;;  %v93_v22 = vld [vmem:[#allocation5 + $0x8] sm:$0xff] }
  0x1c   :  { %159 = vmatpush.msra.mxu1 %v148_v9  ;;  %v92_v23 = vld [vmem:[#allocation5] sm:$0xff]  ;;  %v91_v24 = vld [vmem:[#allocation2] sm:$0xff]  ;;  %v142_v26 = vld [vmem:[#allocation7 + $0x30] sm:$0xff] }
  0x1d   :  { %116 = vmatpush.msra.mxu0 %v103_v5  ;;  %v143_v25 = vld [vmem:[#allocation7 + $0x38] sm:$0xff]  ;;  %v141_v27 = vld [vmem:[#allocation7 + $0x28] sm:$0xff]  ;;  %v140_v28 = vld [vmem:[#allocation7 + $0x20] sm:$0xff] }
  0x1e   :  { %160 = vmatpush.msra.mxu1 %v147_v11  ;;  %v139_v29 = vld [vmem:[#allocation7 + $0x18] sm:$0xff]  ;;  %v138_v30 = vld [vmem:[#allocation7 + $0x10] sm:$0xff]  ;;  %v137_v31 = vld [vmem:[#allocation7 + $0x8] sm:$0xff] }
  0x1f   :  { %117 = vmatpush.msra.mxu0 %v102_v8  ;;  %v136_v32 = vld [vmem:[#allocation7] sm:$0xff]  ;;  %v195_v33 = vld [vmem:[#allocation8 + $0x78] sm:$0xff]  ;;  %v194_v34 = vld [vmem:[#allocation8 + $0x70] sm:$0xff] }
  0x20   :  { %161 = vmatpush.msra.mxu1 %v146_v13  ;;  %200 = vmatpush.msra.mxu2 %v195_v33  ;;  %v193_v35 = vld [vmem:[#allocation8 + $0x68] sm:$0xff]  ;;  %v192_v36 = vld [vmem:[#allocation8 + $0x60] sm:$0xff]  ;;  %v191_v37 = vld [vmem:[#allocation8 + $0x58] sm:$0xff] }
  0x21   :  { %118 = vmatpush.msra.mxu0 %v101_v10  ;;  %v190_v38 = vld [vmem:[#allocation8 + $0x50] sm:$0xff]  ;;  %v189_v39 = vld [vmem:[#allocation8 + $0x48] sm:$0xff]  ;;  %v188_v40 = vld [vmem:[#allocation8 + $0x40] sm:$0xff] }
  0x22   :  { %162 = vmatpush.msra.mxu1 %v145_v15  ;;  %201 = vmatpush.msra.mxu2 %v194_v34  ;;  %v265_v41 = vld [vmem:[%s508_s2] ss:$0 sm:$0xff]  ;;  %v186_v49 = vld [vmem:[#allocation8 + $0x30] sm:$0xff]  ;;  %v185_v50 = vld [vmem:[#allocation8 + $0x28] sm:$0xff] }
  0x23   :  { %119 = vmatpush.msra.mxu0 %v100_v12  ;;  %v187_v48 = vld [vmem:[#allocation8 + $0x38] sm:$0xff]  ;;  %v184_v51 = vld [vmem:[#allocation8 + $0x20] sm:$0xff]  ;;  %v182_v53 = vld [vmem:[#allocation8 + $0x10] sm:$0xff] }
  0x24   :  { %163 = vmatpush.msra.mxu1 %v144_v17  ;;  %202 = vmatpush.msra.mxu2 %v193_v35  ;;  %v183_v52 = vld [vmem:[#allocation8 + $0x18] sm:$0xff]  ;;  %v181_v54 = vld [vmem:[#allocation8 + $0x8] sm:$0xff]  ;;  %v180_v55 = vld [vmem:[#allocation8] sm:$0xff] }
  0x25   :  { %120 = vmatpush.msra.mxu0 %v99_v14  ;;  %v266_v56 = vld [vmem:[%s510_s4] ss:$0 sm:$0xff] }
  0x26   :  { %164 = vmatpush.msra.mxu1 %v143_v25  ;;  %203 = vmatpush.msra.mxu2 %v192_v36  ;;  %v267_v63 = vld [vmem:[%s512_s6] ss:$0 sm:$0xff] }
  0x27   :  { %121 = vmatpush.msra.mxu0 %v98_v16 }
  0x28   :  { %165 = vmatpush.msra.mxu1 %v142_v26  ;;  %204 = vmatpush.msra.mxu2 %v191_v37 }
  0x29   :  { %122 = vmatpush.msra.mxu0 %v97_v18 }
  0x2a   :  { %166 = vmatpush.msra.mxu1 %v141_v27  ;;  %205 = vmatpush.msra.mxu2 %v190_v38 }
  0x2b   :  { %123 = vmatpush.msra.mxu0 %v96_v19 }
  0x2c   :  { %167 = vmatpush.msra.mxu1 %v140_v28  ;;  %206 = vmatpush.msra.mxu2 %v189_v39 }
  0x2d   :  { %124 = vmatpush.msra.mxu0 %v95_v20 }
  0x2e   :  { %168 = vmatpush.msra.mxu1 %v139_v29  ;;  %207 = vmatpush.msra.mxu2 %v188_v40 }
  0x2f   :  { %125 = vmatpush.msra.mxu0 %v94_v21 }
  0x30   :  { %169 = vmatpush.msra.mxu1 %v138_v30  ;;  %208 = vmatpush.msra.mxu2 %v187_v48 }
  0x31   :  { %126 = vmatpush.msra.mxu0 %v93_v22 }
  0x32   :  { %170 = vmatpush.msra.mxu1 %v137_v31  ;;  %209 = vmatpush.msra.mxu2 %v186_v49 }
  0x33   :  { %127 = vmatpush.msra.mxu0 %v92_v23 }
  0x34   :  { %128 = vmatmul.f32.vlgmr.msra.gmra.mxu0 %v91_v24  ;;  %171 = vmatpush.msra.mxu1 %v136_v32 }
  0x35   :  { %210 = vmatpush.msra.mxu2 %v185_v50 }
  0x37   :  { %211 = vmatpush.msra.mxu2 %v184_v51 }
  0x39   :  { %212 = vmatpush.msra.mxu2 %v183_v52 }
  0x3b   :  { %213 = vmatpush.msra.mxu2 %v182_v53 }
  0x3d   :  { %214 = vmatpush.msra.mxu2 %v181_v54 }
  0x3f   :  { %215 = vmatpush.msra.mxu2 %v180_v55 }
  0xb1   :  { %v129_v42 = vpop.f32.mrf.mxu0 }
  0xb2   :  { %v130_v43 = vadd.f32 %v265_v41, %v129_v42 }
  0xb4   :  { %v132_v44 = vmul.f32 0.5, %v130_v43 }
  0xb6   :  { %268 = vtanh.f32 %v132_v44 }
  0xbc   :  { %v269_v45 = vpop.eup %268 }
  0xbd   :  { %v134_v46 = vmul.f32 0.5, %v269_v45 }
  0xbf   :  { %v135_v47 = vadd.f32 0.5, %v134_v46 }
  0xc1   :  { %172 = vmatmul.f32.vlgmr.msra.gmra.mxu1 %v135_v47 }
 0x13e   :  { %v173_v57 = vpop.f32.mrf.mxu1 }
 0x13f   :  { %v174_v58 = vadd.f32 %v266_v56, %v173_v57 }
 0x141   :  { %v176_v59 = vmul.f32 0.5, %v174_v58 }
 0x143   :  { %270 = vtanh.f32 %v176_v59 }
 0x149   :  { %v271_v60 = vpop.eup %270 }
 0x14a   :  { %v178_v61 = vmul.f32 0.5, %v271_v60 }
 0x14c   :  { %v179_v62 = vadd.f32 0.5, %v178_v61 }
 0x14e   :  { %216 = vmatmul.f32.vlgmr.msra.gmra.mxu2 %v179_v62  ;;  %221 = vst [vmem:[#allocation11] sm:$0xff] %v179_v62 }
 0x14f   :  { %243 = dma.vmem_to_hbm [thread:$0]  %s239_s27, 128, %s241_s30, [#allocation12]  }
 0x1d1   :  { %v217_v0 = vpop.f32.mrf.mxu2 }
 0x1d2   :  { %v218_v1 = vadd.f32 %v267_v63, %v217_v0 }
 0x1d4   :  { %220 = vst [vmem:[#allocation10] sm:$0xff] %v218_v1 }
 0x1d5   :  { %232 = dma.vmem_to_hbm [thread:$0]  %s228_s11, 128, %s230_s14, [#allocation4]  }
 0x1d6   :  { %422 = dma.done.wait [#allocation4], 128  }
 0x1d7   :  { %423 = vsyncadd [#allocation4], 4294967168 }
 0x1d8   :  { %424 = dma.done.wait [#allocation12], 128  }
 0x1d9   :  { %425 = vsyncadd [#allocation12], 4294967168 }
 0x1da   :  { %252 = vsyncpa [#allocation3], 1 }
 0x1db   :  { %253 = vsyncpa [#allocation6], 1 }
 0x1dc   :  { %254 = vsyncpa [#allocation9], 1 }
 0x1dd   :  { %255 = vsyncpa [#allocation4], 1 }
 0x1de   :  { %256 = vsyncpa [#allocation12], 1 }

</bundles_post_ra>
